<compile_context>
chip_gen: v5e
topology: v5e:2x2
jax: 0.10.0
libtpu: 0.0.40
codegen_flags: <defaults>
</compile_context>

<pallas_src>
import jax
import jax.numpy as jnp
from jax.experimental import pallas as pl
from jax.experimental.pallas import tpu as pltpu


def _round_up(x: int, m: int) -> int:
    return (x + m - 1) // m * m


def rnn_kernel(xh_ref, whh_ref, why_ref, by_ref, out_ref, h_all_ref):
    """Elman RNN recurrence; input contribution + output projection hoisted.

    xh_ref:    (T, Hp)  f32   per-step input contribution x_t @ W_xh + b_h
    whh_ref:   (Hp, Hp) bf16  hidden -> hidden
    why_ref:   (Hp, Vp) bf16  hidden -> logits
    by_ref:    (1, Vp)  f32   logits bias
    out_ref:   (T, Vp)  f32   output logits
    h_all_ref: (T, Hp)  f32   VMEM scratch: hidden state feeding out[t]
    """
    T = out_ref.shape[0]
    Hp = whh_ref.shape[0]

    # Loop-invariant weight read, held in vregs across the unrolled loop
    # (bf16 -> half the vregs of f32).
    whh = whh_ref[...]

    # h_0 = 0  (so out[0] == b_y after the batched projection below).
    h = jnp.zeros((1, Hp), jnp.float32)
    h_all_ref[pl.ds(0, 1), :] = h
    hb = h.astype(jnp.bfloat16)

    # Fully-unrolled serial recurrence (T is a small static constant).  The
    # per-step critical chain is: bf16 cast -> (1,Hp)@(Hp,Hp) dot -> add -> tanh.
    for t in range(1, T):
        h = jnp.tanh(
            xh_ref[pl.ds(t - 1, 1), :]
            + jnp.dot(hb, whh, preferred_element_type=jnp.float32)
        )
        hb = h.astype(jnp.bfloat16)
        h_all_ref[pl.ds(t, 1), :] = h          # static row index, off the chain

    # Hoisted output projection: one batched bf16 (T,Hp)@(Hp,Vp) matmul with
    # f32 accumulation and a single lane-dense store.
    logits = (
        jnp.dot(
            h_all_ref[...].astype(jnp.bfloat16),
            why_ref[...],
            preferred_element_type=jnp.float32,
        )
        + by_ref[...]
    )
    out_ref[...] = logits.astype(out_ref.dtype)


def rnn_forward(x, wxh, whh, bh, why, by):
    """x: (T, V) stack of one-hot state rows (matches the module's forward(batch))."""
    T, V = x.shape
    H = wxh.shape[1]
    Hp = _round_up(H, 128)
    Vp = _round_up(V, 128)
    assert T % 8 == 0, "pad T to a multiple of 8 for sublane-dense layout"

    # Zero-pad lane dims to multiples of 128.  Padded hidden / logit columns
    # stay exactly zero through the recurrence (tanh(0)=0, zero weight rows),
    # so they are inert and simply sliced off below.
    wxh_p = jnp.pad(wxh, ((0, 0), (0, Hp - H)))
    bh_p = jnp.pad(bh, ((0, 0), (0, Hp - H)))
    whh_p = jnp.pad(whh, ((0, Hp - H), (0, Hp - H))).astype(jnp.bfloat16)
    why_p = jnp.pad(why, ((0, Hp - H), (0, Vp - V))).astype(jnp.bfloat16)
    by_p = jnp.pad(by, ((0, 0), (0, Vp - V)))

    # Hoisted off the serial chain: per-step input contribution + hidden bias,
    # kept in f32.  Using x @ W_xh (instead of an argmax row gather) preserves
    # the exact module semantics even for non-strict-one-hot rows.
    # TODO(synk): at realistic V, replace with a T-row gather of W_xh.
    xh = jnp.dot(x, wxh_p, preferred_element_type=jnp.float32) + bh_p   # (T, Hp)

    vmem = pl.BlockSpec(memory_space=pltpu.MemorySpace.VMEM)
    out_p = pl.pallas_call(
        rnn_kernel,
        out_shape=jax.ShapeDtypeStruct((T, Vp), jnp.float32),
        in_specs=[vmem, vmem, vmem, vmem],
        out_specs=vmem,
        scratch_shapes=[pltpu.VMEM((T, Hp), jnp.float32)],
    )(xh, whh_p, why_p, by_p)
    return out_p[:, :V]


def rnn_forward_ref(x, wxh, whh, bh, why, by):
    """Pure-JAX f32 reference matching the PyTorch forward semantics."""
    T, V = x.shape
    H = wxh.shape[1]
    h0 = jnp.zeros((H,), jnp.float32)

    def step(h, x_t):
        h_new = jnp.tanh(x_t @ wxh + h @ whh + bh[0])
        logits = h_new @ why + by[0]
        return h_new, logits

    _, outs = jax.lax.scan(step, h0, x)           # outs[t] = next_state(x_t)
    first = h0 @ why + by[0]                      # first_state()
    stacked = jnp.concatenate([first[None], outs], axis=0)  # (T+1, V)
    return stacked[:-1]                           # drop last, as in torch forward


if __name__ == "__main__":
    # Small shapes: seq T=8, vocab (num_tokens) V=16, hidden H=32.
    T, V, H = 8, 16, 32

    key = jax.random.PRNGKey(0)
    k_tok, k_wxh, k_whh, k_bh, k_why, k_by = jax.random.split(key, 6)

    # Deterministic "tokenizer" input: one-hot states stacked along the sequence.
    token_ids = jax.random.randint(k_tok, (T,), 0, V)
    x = jax.nn.one_hot(token_ids, V, dtype=jnp.float32)       # (T, V)

    # Deterministic parameter init.
    wxh = 0.1 * jax.random.normal(k_wxh, (V, H), jnp.float32)
    whh = 0.1 * jax.random.normal(k_whh, (H, H), jnp.float32)
    bh = 0.1 * jax.random.normal(k_bh, (1, H), jnp.float32)
    why = 0.1 * jax.random.normal(k_why, (H, V), jnp.float32)
    by = 0.1 * jax.random.normal(k_by, (1, V), jnp.float32)

    out = rnn_forward(x, wxh, whh, bh, why, by)
    out = jax.block_until_ready(out)

    ref = rnn_forward_ref(x, wxh, whh, bh, why, by)
    assert out.shape == (T, V), out.shape
    # bf16 MXU inputs (f32 accumulation) vs. pure-f32 reference: loosened tol.
    assert jnp.allclose(out, ref, atol=1e-2, rtol=1e-2), "mismatch vs reference"

    # TODO(synk): get_token_from_state / autoregress (multinomial sampling) and
    # train_with_data are host-side utilities, not part of forward(); not
    # implemented in-kernel.
    print("KERNEL_OK")
</pallas_src>

<mosaic_0001>
module attributes {stable_mosaic.version = 11 : i64} {
  func.func @rnn_kernel(%arg0: memref<8x128xf32, #tpu.memory_space<vmem>>, %arg1: memref<128x128xbf16, #tpu.memory_space<vmem>>, %arg2: memref<128x128xbf16, #tpu.memory_space<vmem>>, %arg3: memref<1x128xf32, #tpu.memory_space<vmem>>, %arg4: memref<8x128xf32, #tpu.memory_space<vmem>>, %arg5: memref<8x128xf32, #tpu.memory_space<vmem>>) attributes {dimension_semantics = [], scalar_prefetch = 0 : i64, scratch_operands = 1 : i64, tpu.core_type = #tpu.core_type<tc>} {
    %c0 = arith.constant 0 : index
    %c0_0 = arith.constant 0 : index
    %0 = vector.load %arg1[%c0, %c0_0] : memref<128x128xbf16, #tpu.memory_space<vmem>>, vector<128x128xbf16>
    %cst = arith.constant 0.000000e+00 : f32
    %1 = vector.broadcast %cst : f32 to vector<1x128xf32>
    %c0_1 = arith.constant 0 : index
    %c0_2 = arith.constant 0 : index
    %2 = vector.load %arg5[%c0_1, %c0_2] : memref<8x128xf32, #tpu.memory_space<vmem>>, vector<1x128xf32>
    tpu.vector_store %arg5[%c0_1, %c0_2], %1 {strides = array<i32>} : memref<8x128xf32, #tpu.memory_space<vmem>>, vector<1x128xf32>,
    %3 = arith.truncf %1 : vector<1x128xf32> to vector<1x128xbf16>
    %c0_3 = arith.constant 0 : index
    %c0_4 = arith.constant 0 : index
    %4 = vector.load %arg0[%c0_3, %c0_4] : memref<8x128xf32, #tpu.memory_space<vmem>>, vector<1x128xf32>
    %cst_5 = arith.constant dense<0.000000e+00> : vector<1x128xf32>
    %5 = tpu.matmul %3, %0, %cst_5 {dimension_numbers = #tpu.dot_dimension_numbers<[1], [0], [0], [1], [0, 0, 1, 1], [], []>} : vector<1x128xbf16>, vector<128x128xbf16>, vector<1x128xf32> -> vector<1x128xf32>
    %6 = arith.addf %4, %5 : vector<1x128xf32>
    %7 = math.tanh %6 : vector<1x128xf32>
    %8 = arith.truncf %7 : vector<1x128xf32> to vector<1x128xbf16>
    %c1 = arith.constant 1 : index
    %c0_6 = arith.constant 0 : index
    %9 = vector.load %arg5[%c1, %c0_6] : memref<8x128xf32, #tpu.memory_space<vmem>>, vector<1x128xf32>
    tpu.vector_store %arg5[%c1, %c0_6], %7 {strides = array<i32>} : memref<8x128xf32, #tpu.memory_space<vmem>>, vector<1x128xf32>,
    %c1_7 = arith.constant 1 : index
    %c0_8 = arith.constant 0 : index
    %10 = vector.load %arg0[%c1_7, %c0_8] : memref<8x128xf32, #tpu.memory_space<vmem>>, vector<1x128xf32>
    %cst_9 = arith.constant dense<0.000000e+00> : vector<1x128xf32>
    %11 = tpu.matmul %8, %0, %cst_9 {dimension_numbers = #tpu.dot_dimension_numbers<[1], [0], [0], [1], [0, 0, 1, 1], [], []>} : vector<1x128xbf16>, vector<128x128xbf16>, vector<1x128xf32> -> vector<1x128xf32>
    %12 = arith.addf %10, %11 : vector<1x128xf32>
    %13 = math.tanh %12 : vector<1x128xf32>
    %14 = arith.truncf %13 : vector<1x128xf32> to vector<1x128xbf16>
    %c2 = arith.constant 2 : index
    %c0_10 = arith.constant 0 : index
    %15 = vector.load %arg5[%c2, %c0_10] : memref<8x128xf32, #tpu.memory_space<vmem>>, vector<1x128xf32>
    tpu.vector_store %arg5[%c2, %c0_10], %13 {strides = array<i32>} : memref<8x128xf32, #tpu.memory_space<vmem>>, vector<1x128xf32>,
    %c2_11 = arith.constant 2 : index
    %c0_12 = arith.constant 0 : index
    %16 = vector.load %arg0[%c2_11, %c0_12] : memref<8x128xf32, #tpu.memory_space<vmem>>, vector<1x128xf32>
    %cst_13 = arith.constant dense<0.000000e+00> : vector<1x128xf32>
    %17 = tpu.matmul %14, %0, %cst_13 {dimension_numbers = #tpu.dot_dimension_numbers<[1], [0], [0], [1], [0, 0, 1, 1], [], []>} : vector<1x128xbf16>, vector<128x128xbf16>, vector<1x128xf32> -> vector<1x128xf32>
    %18 = arith.addf %16, %17 : vector<1x128xf32>
    %19 = math.tanh %18 : vector<1x128xf32>
    %20 = arith.truncf %19 : vector<1x128xf32> to vector<1x128xbf16>
    %c3 = arith.constant 3 : index
    %c0_14 = arith.constant 0 : index
    %21 = vector.load %arg5[%c3, %c0_14] : memref<8x128xf32, #tpu.memory_space<vmem>>, vector<1x128xf32>
    tpu.vector_store %arg5[%c3, %c0_14], %19 {strides = array<i32>} : memref<8x128xf32, #tpu.memory_space<vmem>>, vector<1x128xf32>,
    %c3_15 = arith.constant 3 : index
    %c0_16 = arith.constant 0 : index
    %22 = vector.load %arg0[%c3_15, %c0_16] : memref<8x128xf32, #tpu.memory_space<vmem>>, vector<1x128xf32>
    %cst_17 = arith.constant dense<0.000000e+00> : vector<1x128xf32>
    %23 = tpu.matmul %20, %0, %cst_17 {dimension_numbers = #tpu.dot_dimension_numbers<[1], [0], [0], [1], [0, 0, 1, 1], [], []>} : vector<1x128xbf16>, vector<128x128xbf16>, vector<1x128xf32> -> vector<1x128xf32>
    %24 = arith.addf %22, %23 : vector<1x128xf32>
    %25 = math.tanh %24 : vector<1x128xf32>
    %26 = arith.truncf %25 : vector<1x128xf32> to vector<1x128xbf16>
    %c4 = arith.constant 4 : index
    %c0_18 = arith.constant 0 : index
    %27 = vector.load %arg5[%c4, %c0_18] : memref<8x128xf32, #tpu.memory_space<vmem>>, vector<1x128xf32>
    tpu.vector_store %arg5[%c4, %c0_18], %25 {strides = array<i32>} : memref<8x128xf32, #tpu.memory_space<vmem>>, vector<1x128xf32>,
    %c4_19 = arith.constant 4 : index
    %c0_20 = arith.constant 0 : index
    %28 = vector.load %arg0[%c4_19, %c0_20] : memref<8x128xf32, #tpu.memory_space<vmem>>, vector<1x128xf32>
    %cst_21 = arith.constant dense<0.000000e+00> : vector<1x128xf32>
    %29 = tpu.matmul %26, %0, %cst_21 {dimension_numbers = #tpu.dot_dimension_numbers<[1], [0], [0], [1], [0, 0, 1, 1], [], []>} : vector<1x128xbf16>, vector<128x128xbf16>, vector<1x128xf32> -> vector<1x128xf32>
    %30 = arith.addf %28, %29 : vector<1x128xf32>
    %31 = math.tanh %30 : vector<1x128xf32>
    %32 = arith.truncf %31 : vector<1x128xf32> to vector<1x128xbf16>
    %c5 = arith.constant 5 : index
    %c0_22 = arith.constant 0 : index
    %33 = vector.load %arg5[%c5, %c0_22] : memref<8x128xf32, #tpu.memory_space<vmem>>, vector<1x128xf32>
    tpu.vector_store %arg5[%c5, %c0_22], %31 {strides = array<i32>} : memref<8x128xf32, #tpu.memory_space<vmem>>, vector<1x128xf32>,
    %c5_23 = arith.constant 5 : index
    %c0_24 = arith.constant 0 : index
    %34 = vector.load %arg0[%c5_23, %c0_24] : memref<8x128xf32, #tpu.memory_space<vmem>>, vector<1x128xf32>
    %cst_25 = arith.constant dense<0.000000e+00> : vector<1x128xf32>
    %35 = tpu.matmul %32, %0, %cst_25 {dimension_numbers = #tpu.dot_dimension_numbers<[1], [0], [0], [1], [0, 0, 1, 1], [], []>} : vector<1x128xbf16>, vector<128x128xbf16>, vector<1x128xf32> -> vector<1x128xf32>
    %36 = arith.addf %34, %35 : vector<1x128xf32>
    %37 = math.tanh %36 : vector<1x128xf32>
    %38 = arith.truncf %37 : vector<1x128xf32> to vector<1x128xbf16>
    %c6 = arith.constant 6 : index
    %c0_26 = arith.constant 0 : index
    %39 = vector.load %arg5[%c6, %c0_26] : memref<8x128xf32, #tpu.memory_space<vmem>>, vector<1x128xf32>
    tpu.vector_store %arg5[%c6, %c0_26], %37 {strides = array<i32>} : memref<8x128xf32, #tpu.memory_space<vmem>>, vector<1x128xf32>,
    %c6_27 = arith.constant 6 : index
    %c0_28 = arith.constant 0 : index
    %40 = vector.load %arg0[%c6_27, %c0_28] : memref<8x128xf32, #tpu.memory_space<vmem>>, vector<1x128xf32>
    %cst_29 = arith.constant dense<0.000000e+00> : vector<1x128xf32>
    %41 = tpu.matmul %38, %0, %cst_29 {dimension_numbers = #tpu.dot_dimension_numbers<[1], [0], [0], [1], [0, 0, 1, 1], [], []>} : vector<1x128xbf16>, vector<128x128xbf16>, vector<1x128xf32> -> vector<1x128xf32>
    %42 = arith.addf %40, %41 : vector<1x128xf32>
    %43 = math.tanh %42 : vector<1x128xf32>
    %c7 = arith.constant 7 : index
    %c0_30 = arith.constant 0 : index
    %44 = vector.load %arg5[%c7, %c0_30] : memref<8x128xf32, #tpu.memory_space<vmem>>, vector<1x128xf32>
    tpu.vector_store %arg5[%c7, %c0_30], %43 {strides = array<i32>} : memref<8x128xf32, #tpu.memory_space<vmem>>, vector<1x128xf32>,
    %c0_31 = arith.constant 0 : index
    %c0_32 = arith.constant 0 : index
    %45 = vector.load %arg5[%c0_31, %c0_32] : memref<8x128xf32, #tpu.memory_space<vmem>>, vector<8x128xf32>
    %46 = arith.truncf %45 : vector<8x128xf32> to vector<8x128xbf16>
    %c0_33 = arith.constant 0 : index
    %c0_34 = arith.constant 0 : index
    %47 = vector.load %arg2[%c0_33, %c0_34] : memref<128x128xbf16, #tpu.memory_space<vmem>>, vector<128x128xbf16>
    %cst_35 = arith.constant dense<0.000000e+00> : vector<8x128xf32>
    %48 = tpu.matmul %46, %47, %cst_35 {dimension_numbers = #tpu.dot_dimension_numbers<[1], [0], [0], [1], [0, 0, 1, 1], [], []>} : vector<8x128xbf16>, vector<128x128xbf16>, vector<8x128xf32> -> vector<8x128xf32>
    %c0_36 = arith.constant 0 : index
    %c0_37 = arith.constant 0 : index
    %49 = vector.load %arg3[%c0_36, %c0_37] : memref<1x128xf32, #tpu.memory_space<vmem>>, vector<1x128xf32>
    %50 = vector.broadcast %49 : vector<1x128xf32> to vector<8x128xf32>
    %51 = arith.addf %48, %50 : vector<8x128xf32>
    %c0_38 = arith.constant 0 : index
    %c0_39 = arith.constant 0 : index
    %52 = vector.load %arg4[%c0_38, %c0_39] : memref<8x128xf32, #tpu.memory_space<vmem>>, vector<8x128xf32>
    tpu.vector_store %arg4[%c0_38, %c0_39], %51 {strides = array<i32>} : memref<8x128xf32, #tpu.memory_space<vmem>>, vector<8x128xf32>,
    return
  }
}

</mosaic_0001>

<bundles_post_ra>
// kernel: tpu_custom_call.1
= control target key start
LH: loop header
LB: loop body
LE: loop exit
PB: predicated region body
PF: predicated region fallthrough
CT: control target
= control target key end

     0   :  { %9 = vsyncpa [#allocation4], 0  ;;  %s609_s0 = inlined_call_operand.hbm [shape: f32[8,128], index: 0, kind: input, shape index: {}]   ;;  %s610_s1 = inlined_call_operand.hbm [shape: bf16[128,128], index: 1, kind: input, shape index: {}]   ;;  %s611_s2 = inlined_call_operand.hbm [shape: bf16[128,128], index: 2, kind: input, shape index: {}]   ;;  %s612_s3 = inlined_call_operand.vmem [shape: f32[1,128], index: 3, kind: input, shape index: {}]   ;;  %s613_s4 = inlined_call_operand.hbm [shape: f32[8,128], index: 4, kind: output, shape index: {}]  }
   0x1   :  { %10 = vsyncpa [#allocation7], 0  ;;  %s27_s17 = sshll.u32 %s610_s1, 4  ;;  %s28_s17 = int_to_ptr.hbm [resolvable:$true] %s27_s17 }
   0x2   :  { %11 = vsyncpa [#allocation5], 0  ;;  %s561_s18 = smov [#allocation6]   ;;  %s17_s22 = sshll.u32 %s609_s0, 4  ;;  %s18_s22 = int_to_ptr.hbm [resolvable:$true] %s17_s22 }
   0x3   :  { %s29_s19 = sshll.u32 %s561_s18, 4  ;;  %s562_s23 = smov 64   ;;  %s30_s19 = int_to_ptr.vmem [resolvable:$true] %s29_s19 }
   0x4   :  { %s563_s24 = smov 4   ;;  %s564_s25 = smov [#allocation3]  }
   0x5   :  { %35 = dma.hbm_to_vmem [thread:$0]  %s28_s17, 1024, %s30_s19, [#allocation7], %s562_s23, %s562_s23, %s563_s24  }
   0x6   :  { %s19_s26 = sshll.u32 %s564_s25, 4  ;;  %s40_s29 = sshll.u32 %s611_s2, 4  ;;  %s20_s26 = int_to_ptr.vmem [resolvable:$true] %s19_s26  ;;  %s41_s29 = int_to_ptr.hbm [resolvable:$true] %s40_s29 }
   0x7   :  { %22 = dma.hbm_to_vmem [thread:$0]  %s18_s22, 128, %s20_s26, [#allocation4]  }
   0x8   :  { %s565_s1 = smov [#allocation8]  }
   0x9   :  { %s42_s30 = sshll.u32 %s565_s1, 4  ;;  %s43_s30 = int_to_ptr.vmem [resolvable:$true] %s42_s30 }
   0xa   :  { %48 = dma.hbm_to_vmem [thread:$0]  %s41_s29, 1024, %s43_s30, [#allocation7], %s562_s23, %s562_s23, %s563_s24  }
   0xb   :  { %555 = dma.done.wait [#allocation4], 128  }
   0xc   :  { %556 = vsyncadd [#allocation4], 4294967168 }
   0xd   :  { %557 = dma.done.wait [#allocation7], 2048  }
   0xe   :  { %558 = vsyncadd [#allocation7], 4294965248  ;;  %v427_v0 = vld [vmem:[#allocation6 + $0x38] sm:$0xff]  ;;  %v426_v1 = vld [vmem:[#allocation6 + $0x30] sm:$0xff]  ;;  %v566_v8 = vmov 0   ;;  %v567_v52 = vmov 0.0  }
   0xf   :  { %130 = vmatpush.bf16.msra.mxu0 %v427_v0  ;;  %148 = vmatpush.bf16.msra.mxu1 %v427_v0  ;;  %v425_v2 = vld [vmem:[#allocation6 + $0x28] sm:$0xff]  ;;  %v424_v3 = vld [vmem:[#allocation6 + $0x20] sm:$0xff]  ;;  %v423_v4 = vld [vmem:[#allocation6 + $0x18] sm:$0xff]  ;;  %80 = vst [vmem:[#allocation2] sm:$0x1] %v567_v52  ;;  %s568_s5 = smov [#allocation9]  }
  0x10   :  { %166 = vmatpush.bf16.msra.mxu2 %v427_v0  ;;  %184 = vmatpush.bf16.msra.mxu3 %v427_v0  ;;  %v422_v5 = vld [vmem:[#allocation6 + $0x10] sm:$0xff]  ;;  %v421_v6 = vld [vmem:[#allocation6 + $0x8] sm:$0xff]  ;;  %v420_v7 = vld [vmem:[#allocation6] sm:$0xff]  ;;  %s343_s6 = sshll.u32 %s568_s5, 4  ;;  %s345_s9 = sshll.u32 %s613_s4, 4  ;;  %s344_s6 = int_to_ptr.vmem [resolvable:$true] %s343_s6  ;;  %s346_s9 = int_to_ptr.hbm [resolvable:$true] %s345_s9 }
  0x11   :  { %v81_v9 = vld [vmem:[#allocation3] sm:$0x1]  ;;  %v147_v15 = vld [vmem:[#allocation3 + $0x1] sm:$0x1]  ;;  %v165_v21 = vld [vmem:[#allocation3 + $0x2] sm:$0x1] }
  0x12   :  { %v183_v27 = vld [vmem:[#allocation3 + $0x3] sm:$0x1]  ;;  %v201_v33 = vld [vmem:[#allocation3 + $0x4] sm:$0x1]  ;;  %v434_v40 = vld [vmem:[#allocation8 + $0x30] sm:$0xff] }
  0x13   :  { %131 = vmatpush.bf16.msra.mxu0 %v426_v1  ;;  %149 = vmatpush.bf16.msra.mxu1 %v426_v1  ;;  %v435_v39 = vld [vmem:[#allocation8 + $0x38] sm:$0xff]  ;;  %v433_v41 = vld [vmem:[#allocation8 + $0x28] sm:$0xff]  ;;  %v432_v48 = vld [vmem:[#allocation8 + $0x20] sm:$0xff] }
  0x14   :  { %167 = vmatpush.bf16.msra.mxu2 %v426_v1  ;;  %185 = vmatpush.bf16.msra.mxu3 %v426_v1  ;;  %v219_v42 = vld [vmem:[#allocation3 + $0x5] sm:$0x1]  ;;  %v430_v50 = vld [vmem:[#allocation8 + $0x10] sm:$0xff]  ;;  %v429_v51 = vld [vmem:[#allocation8 + $0x8] sm:$0xff] }
  0x15   :  { %v431_v49 = vld [vmem:[#allocation8 + $0x18] sm:$0xff]  ;;  %v428_v53 = vld [vmem:[#allocation8] sm:$0xff]  ;;  %v444_v61 = vld [vmem:[%s612_s3] ss:$0 sm:$0xff] }
  0x16   :  { %v237_v54 = vld [vmem:[#allocation3 + $0x6] sm:$0x1] }
  0x17   :  { %132 = vmatpush.bf16.msra.mxu0 %v425_v2  ;;  %150 = vmatpush.bf16.msra.mxu1 %v425_v2 }
  0x18   :  { %168 = vmatpush.bf16.msra.mxu2 %v425_v2  ;;  %186 = vmatpush.bf16.msra.mxu3 %v425_v2 }
  0x1b   :  { %133 = vmatpush.bf16.msra.mxu0 %v424_v3  ;;  %151 = vmatpush.bf16.msra.mxu1 %v424_v3 }
  0x1c   :  { %169 = vmatpush.bf16.msra.mxu2 %v424_v3  ;;  %187 = vmatpush.bf16.msra.mxu3 %v424_v3 }
  0x1f   :  { %134 = vmatpush.bf16.msra.mxu0 %v423_v4  ;;  %152 = vmatpush.bf16.msra.mxu1 %v423_v4 }
  0x20   :  { %170 = vmatpush.bf16.msra.mxu2 %v423_v4  ;;  %188 = vmatpush.bf16.msra.mxu3 %v423_v4 }
  0x23   :  { %135 = vmatpush.bf16.msra.mxu0 %v422_v5  ;;  %153 = vmatpush.bf16.msra.mxu1 %v422_v5 }
  0x24   :  { %171 = vmatpush.bf16.msra.mxu2 %v422_v5  ;;  %189 = vmatpush.bf16.msra.mxu3 %v422_v5 }
  0x27   :  { %136 = vmatpush.bf16.msra.mxu0 %v421_v6  ;;  %154 = vmatpush.bf16.msra.mxu1 %v421_v6 }
  0x28   :  { %172 = vmatpush.bf16.msra.mxu2 %v421_v6  ;;  %190 = vmatpush.bf16.msra.mxu3 %v421_v6 }
  0x2b   :  { %137 = vmatpush.bf16.msra.mxu0 %v420_v7  ;;  %155 = vmatpush.bf16.msra.mxu1 %v420_v7 }
  0x2c   :  { %173 = vmatpush.bf16.msra.mxu2 %v420_v7  ;;  %191 = vmatpush.bf16.msra.mxu3 %v420_v7 }
  0x2e   :  { %138 = vmatmul.bf16.vlgmr.msra.gmra.mxu0 %v566_v8 }
  0x2f   :  { %202 = vmatpush.bf16.msrb.mxu0 %v427_v0  ;;  %220 = vmatpush.bf16.msrb.mxu1 %v427_v0 }
  0x30   :  { %238 = vmatpush.bf16.msrb.mxu2 %v427_v0  ;;  %324 = vmatpush.bf16.msrb.mxu3 %v435_v39 }
  0x33   :  { %203 = vmatpush.bf16.msrb.mxu0 %v426_v1  ;;  %221 = vmatpush.bf16.msrb.mxu1 %v426_v1 }
  0x34   :  { %239 = vmatpush.bf16.msrb.mxu2 %v426_v1  ;;  %325 = vmatpush.bf16.msrb.mxu3 %v434_v40 }
  0x37   :  { %204 = vmatpush.bf16.msrb.mxu0 %v425_v2  ;;  %222 = vmatpush.bf16.msrb.mxu1 %v425_v2 }
  0x38   :  { %240 = vmatpush.bf16.msrb.mxu2 %v425_v2  ;;  %326 = vmatpush.bf16.msrb.mxu3 %v433_v41 }
  0x3b   :  { %205 = vmatpush.bf16.msrb.mxu0 %v424_v3  ;;  %223 = vmatpush.bf16.msrb.mxu1 %v424_v3 }
  0x3c   :  { %241 = vmatpush.bf16.msrb.mxu2 %v424_v3  ;;  %327 = vmatpush.bf16.msrb.mxu3 %v432_v48 }
  0x3f   :  { %206 = vmatpush.bf16.msrb.mxu0 %v423_v4  ;;  %224 = vmatpush.bf16.msrb.mxu1 %v423_v4 }
  0x40   :  { %242 = vmatpush.bf16.msrb.mxu2 %v423_v4  ;;  %328 = vmatpush.bf16.msrb.mxu3 %v431_v49 }
  0x43   :  { %207 = vmatpush.bf16.msrb.mxu0 %v422_v5  ;;  %225 = vmatpush.bf16.msrb.mxu1 %v422_v5 }
  0x44   :  { %243 = vmatpush.bf16.msrb.mxu2 %v422_v5  ;;  %329 = vmatpush.bf16.msrb.mxu3 %v430_v50 }
  0x47   :  { %208 = vmatpush.bf16.msrb.mxu0 %v421_v6  ;;  %226 = vmatpush.bf16.msrb.mxu1 %v421_v6 }
  0x48   :  { %244 = vmatpush.bf16.msrb.mxu2 %v421_v6  ;;  %330 = vmatpush.bf16.msrb.mxu3 %v429_v51 }
  0x4b   :  { %209 = vmatpush.bf16.msrb.mxu0 %v420_v7  ;;  %227 = vmatpush.bf16.msrb.mxu1 %v420_v7 }
  0x4c   :  { %245 = vmatpush.bf16.msrb.mxu2 %v420_v7  ;;  %331 = vmatpush.bf16.msrb.mxu3 %v428_v53 }
  0xab   :  { %v139_v10 = vpop.f32.mrf.mxu0 }
  0xac   :  { %v143_v11 = vadd.f32 %v139_v10, %v81_v9 }
  0xae   :  { %445 = vtanh.f32 %v143_v11 }
  0xb3   :  { %v141_v12 = vpop.f32.mrf.mxu0 }
  0xb4   :  { %v446_v13 = vpop.eup %445 }
  0xb5   :  { %146 = vst [vmem:[#allocation2 + $0x1] sm:$0x1] %v446_v13  ;;  %v145_v14 = vpack.c.bf16 %v446_v13, %v446_v13 }
  0xb7   :  { %156 = vmatmul.bf16.vlgmr.msra.gmra.mxu1 %v145_v14 }
 0x134   :  { %v157_v16 = vpop.f32.mrf.mxu1 }
 0x135   :  { %v161_v17 = vadd.f32 %v157_v16, %v147_v15 }
 0x137   :  { %447 = vtanh.f32 %v161_v17 }
 0x13c   :  { %v159_v18 = vpop.f32.mrf.mxu1 }
 0x13d   :  { %v448_v19 = vpop.eup %447 }
 0x13e   :  { %164 = vst [vmem:[#allocation2 + $0x2] sm:$0x1] %v448_v19  ;;  %v163_v20 = vpack.c.bf16 %v448_v19, %v448_v19 }
 0x140   :  { %174 = vmatmul.bf16.vlgmr.msra.gmra.mxu2 %v163_v20 }
 0x1c3   :  { %v175_v22 = vpop.f32.mrf.mxu2 }
 0x1c4   :  { %v179_v23 = vadd.f32 %v175_v22, %v165_v21 }
 0x1c6   :  { %449 = vtanh.f32 %v179_v23 }
 0x1cb   :  { %v177_v24 = vpop.f32.mrf.mxu2 }
 0x1cc   :  { %v450_v25 = vpop.eup %449 }
 0x1cd   :  { %182 = vst [vmem:[#allocation2 + $0x3] sm:$0x1] %v450_v25  ;;  %v181_v26 = vpack.c.bf16 %v450_v25, %v450_v25 }
 0x1cf   :  { %192 = vmatmul.bf16.vlgmr.msra.gmra.mxu3 %v181_v26 }
 0x252   :  { %v193_v28 = vpop.f32.mrf.mxu3 }
 0x253   :  { %v197_v29 = vadd.f32 %v193_v28, %v183_v27 }
 0x255   :  { %451 = vtanh.f32 %v197_v29 }
 0x25a   :  { %v195_v30 = vpop.f32.mrf.mxu3 }
 0x25b   :  { %v452_v31 = vpop.eup %451 }
 0x25c   :  { %200 = vst [vmem:[#allocation2 + $0x4] sm:$0x1] %v452_v31  ;;  %v199_v32 = vpack.c.bf16 %v452_v31, %v452_v31 }
 0x25e   :  { %210 = vmatmul.bf16.vlgmr.msrb.gmra.mxu0 %v199_v32 }
 0x2db   :  { %v211_v34 = vpop.f32.mrf.mxu0 }
 0x2dc   :  { %v215_v35 = vadd.f32 %v211_v34, %v201_v33 }
 0x2de   :  { %453 = vtanh.f32 %v215_v35 }
 0x2e3   :  { %v213_v36 = vpop.f32.mrf.mxu0 }
 0x2e4   :  { %v454_v37 = vpop.eup %453 }
 0x2e5   :  { %218 = vst [vmem:[#allocation2 + $0x5] sm:$0x1] %v454_v37  ;;  %v217_v38 = vpack.c.bf16 %v454_v37, %v454_v37 }
 0x2e7   :  { %228 = vmatmul.bf16.vlgmr.msrb.gmra.mxu1 %v217_v38 }
 0x364   :  { %v229_v43 = vpop.f32.mrf.mxu1 }
 0x365   :  { %v233_v44 = vadd.f32 %v229_v43, %v219_v42 }
 0x367   :  { %455 = vtanh.f32 %v233_v44 }
 0x36c   :  { %v231_v45 = vpop.f32.mrf.mxu1 }
 0x36d   :  { %v456_v46 = vpop.eup %455 }
 0x36e   :  { %236 = vst [vmem:[#allocation2 + $0x6] sm:$0x1] %v456_v46  ;;  %v235_v47 = vpack.c.bf16 %v456_v46, %v456_v46 }
 0x370   :  { %246 = vmatmul.bf16.vlgmr.msrb.gmra.mxu2 %v235_v47 }
 0x3f3   :  { %v247_v55 = vpop.f32.mrf.mxu2 }
 0x3f4   :  { %v251_v56 = vadd.f32 %v247_v55, %v237_v54 }
 0x3f6   :  { %457 = vtanh.f32 %v251_v56 }
 0x3fb   :  { %v249_v57 = vpop.f32.mrf.mxu2 }
 0x3fc   :  { %v458_v58 = vpop.eup %457 }
 0x3fd   :  { %253 = vst [vmem:[#allocation2 + $0x7] sm:$0x1] %v458_v58 }
 0x404   :  { %v254_v59 = vld [vmem:[#allocation2] sm:$0xff] }
 0x405   :  { %v255_v60 = vpack.c.bf16 %v254_v59, %v254_v59 }
 0x407   :  { %332 = vmatmul.bf16.vlgmr.msrb.gmra.mxu3 %v255_v60 }
 0x48a   :  { %v333_v62 = vpop.f32.mrf.mxu3 }
 0x48b   :  { %v334_v63 = vadd.f32 %v444_v61, %v333_v62 }
 0x48d   :  { %337 = vst [vmem:[#allocation9] sm:$0xff] %v334_v63 }
 0x48e   :  { %348 = dma.vmem_to_hbm [thread:$0]  %s344_s6, 128, %s346_s9, [#allocation5]  }
 0x492   :  { %v335_v0 = vpop.f32.mrf.mxu3 }
 0x493   :  { %559 = dma.done.wait [#allocation5], 128  }
 0x494   :  { %560 = vsyncadd [#allocation5], 4294967168 }
 0x495   :  { %353 = vsyncpa [#allocation4], 1 }
 0x496   :  { %354 = vsyncpa [#allocation7], 1 }
 0x497   :  { %355 = vsyncpa [#allocation5], 1 }

</bundles_post_ra>
